<compile_context>
chip_gen: v6e
topology: v6e:2x2x1
jax: 0.10.0
libtpu: 0.0.40
codegen_flags: <defaults>
</compile_context>

<pallas_src>
import jax
import jax.numpy as jnp
from jax.experimental import pallas as pl
from jax.experimental.pallas import tpu as pltpu


# ---------------------------------------------------------------------------
# Kernels
# ---------------------------------------------------------------------------
def _scores(x_ref, w_ref):
    """w . x_i per (batch, position): native-dtype multiply, f32 reduction."""
    x = x_ref[...]                            # (TB, L, H) native dtype
    w = w_ref[...].astype(x.dtype)            # (1, 1, H) lane-broadcast
    return jnp.sum(x * w, axis=-1, dtype=jnp.float32)   # (TB, L) f32


def _softmax_rows(scores):
    """Numerically stable softmax over the last (sequence) axis, exact divide."""
    m = jnp.max(scores, axis=-1, keepdims=True)
    e = jnp.exp(scores - m)
    return e / jnp.sum(e, axis=-1, keepdims=True)


def linear_seq_attn_kernel(x_ref, w_ref, o_ref):
    o_ref[...] = _softmax_rows(_scores(x_ref, w_ref)).astype(o_ref.dtype)


def linear_seq_attn_masked_kernel(x_ref, w_ref, mask_ref, o_ref):
    s = _scores(x_ref, w_ref)
    s = jnp.where(mask_ref[...] != 0, -jnp.inf, s)       # masked_fill(-inf)
    o_ref[...] = _softmax_rows(s).astype(o_ref.dtype)


# ---------------------------------------------------------------------------
# Tiling / VMEM sizing
# ---------------------------------------------------------------------------
def _vmem_budget_and_limit():
    """Return (tile budget bytes, vmem_limit_bytes or None) per generation."""
    try:
        cap = getattr(pltpu.get_tpu_info(), "vmem_capacity_bytes", None)
    except Exception:           # no TPU info available (e.g. interpret mode)
        cap = None
    if not cap:
        # Conservative: fits under every generation's default scoped limit.
        return 12 * 1024 * 1024, None
    # v5e/v6e: 128 MiB physical -> 96 MiB limit, 48 MiB double-buffer budget.
    # v7x:      64 MiB physical -> 48 MiB limit, 24 MiB double-buffer budget.
    limit = min(cap * 3 // 4, 96 * 1024 * 1024)
    return limit // 2, limit


def _choose_batch_tile(B, L, H, itemsize, vmem_budget):
    """Largest batch tile whose double-buffered input+output fits the budget."""
    # Double-buffered x block + f32 output block (+ small mask/bookkeeping slack).
    per_row = 2 * (L * H * itemsize + 2 * L * 4)
    tb = max(1, int(vmem_budget) // per_row)
    tb = min(tb, B)
    # v7x megacore: keep >= 2 grid steps so both TensorCores get work, but only
    # when the resulting tile can stay a multiple of 8 (sublane-friendly).
    if B >= 16:
        tb = min(tb, pl.cdiv(B, 2))
    if tb < B:
        tb = min(B, max(8, (tb // 8) * 8))
    # TODO(synk): if even tb == 1 blows the budget (huge L*H), fall back to an
    # L-tiled online softmax instead of a single oversubscribed block.
    return tb


# ---------------------------------------------------------------------------
# Wrapper
# ---------------------------------------------------------------------------
def linear_seq_attn(x, weight, bias=None, x_mask=None):
    """Forward of LinearSeqAttn.

    x: (B, L, H) float (f32/bf16/f16 — streamed in native dtype)
    weight: (H,)    bias: scalar, unused (softmax is shift-invariant)
    x_mask: optional (B, L) bool/int; nonzero/True = padded position.
    Returns alpha: (B, L) float32, each unmasked row sums to 1.
    """
    del bias  # softmax(s + b) == softmax(s)
    B, L, H = x.shape
    w3d = weight.reshape(1, 1, H).astype(jnp.float32)

    budget, vmem_limit = _vmem_budget_and_limit()
    TB = _choose_batch_tile(B, L, H, x.dtype.itemsize, budget)
    grid = (pl.cdiv(B, TB),)

    in_specs = [
        pl.BlockSpec((TB, L, H), lambda i: (i, 0, 0)),
        pl.BlockSpec((1, 1, H), lambda i: (0, 0, 0)),
    ]
    operands = [x, w3d]
    kernel = linear_seq_attn_kernel
    mask_bytes = 0
    if x_mask is not None:
        in_specs.append(pl.BlockSpec((TB, L), lambda i: (i, 0)))
        operands.append(x_mask.astype(jnp.int32))
        kernel = linear_seq_attn_masked_kernel
        mask_bytes = B * L * 4

    cost = pl.CostEstimate(
        flops=2 * B * L * H,
        transcendentals=B * L,
        bytes_accessed=B * L * H * x.dtype.itemsize + B * L * 4 + mask_bytes + H * 4,
    )

    return pl.pallas_call(
        kernel,
        out_shape=jax.ShapeDtypeStruct((B, L), jnp.float32),
        grid=grid,
        in_specs=in_specs,
        out_specs=pl.BlockSpec((TB, L), lambda i: (i, 0)),
        compiler_params=pltpu.CompilerParams(
            dimension_semantics=("parallel",),
            vmem_limit_bytes=vmem_limit,
        ),
        cost_estimate=cost,
    )(*operands)


# ---------------------------------------------------------------------------
# Self-test
# ---------------------------------------------------------------------------
if __name__ == "__main__":
    # small deterministic example: batch=2, len=8, hidden=32
    B, L, H = 2, 8, 32
    key = jax.random.PRNGKey(0)
    kx, kw, kb = jax.random.split(key, 3)

    x = jax.random.normal(kx, (B, L, H), dtype=jnp.float32)
    # deterministic "Linear(input_size, 1)" parameters (uniform like PyTorch init)
    bound = 1.0 / (H ** 0.5)
    weight = jax.random.uniform(kw, (H,), minval=-bound, maxval=bound, dtype=jnp.float32)
    bias = jax.random.uniform(kb, (), minval=-bound, maxval=bound, dtype=jnp.float32)

    # --- unmasked path ---
    alpha = jax.block_until_ready(linear_seq_attn(x, weight, bias))
    scores_ref = jnp.einsum("blh,h->bl", x, weight) + bias
    alpha_ref = jax.nn.softmax(scores_ref, axis=-1)
    assert alpha.shape == (B, L)
    assert jnp.allclose(alpha, alpha_ref, atol=1e-5, rtol=1e-5)
    assert jnp.allclose(jnp.sum(alpha, axis=-1), 1.0, atol=1e-5)

    # --- masked path (True == padded position; every row keeps >=1 valid pos) ---
    x_mask = jnp.zeros((B, L), dtype=bool).at[0, L - 3:].set(True)
    alpha_m = jax.block_until_ready(linear_seq_attn(x, weight, bias, x_mask=x_mask))
    alpha_m_ref = jax.nn.softmax(jnp.where(x_mask, -jnp.inf, scores_ref), axis=-1)
    assert jnp.allclose(alpha_m, alpha_m_ref, atol=1e-5, rtol=1e-5)
    assert jnp.all(alpha_m[0, L - 3:] == 0.0)
    assert jnp.allclose(jnp.sum(alpha_m, axis=-1), 1.0, atol=1e-5)

    print("KERNEL_OK")
</pallas_src>

<mosaic_0001>
module attributes {stable_mosaic.version = 11 : i64} {
  func.func @linear_seq_attn_kernel(%arg0: i32, %arg1: memref<2x8x32xf32, #tpu.memory_space<vmem>>, %arg2: memref<1x1x32xf32, #tpu.memory_space<vmem>>, %arg3: memref<2x8xf32, #tpu.memory_space<vmem>>) attributes {dimension_semantics = [#tpu.dimension_semantics<parallel>], iteration_bounds = array<i64: 1>, scalar_prefetch = 0 : i64, scratch_operands = 0 : i64, tpu.core_type = #tpu.core_type<tc>, window_params = [{transform_indices = @transform_0, window_bounds = array<i64: 2, 8, 32>}, {pipeline_mode = #tpu.pipeline_mode<synchronous>, transform_indices = @transform_1, window_bounds = array<i64: 1, 1, 32>}, {transform_indices = @transform_2, window_bounds = array<i64: 2, 8>}]} {
    %c0 = arith.constant 0 : index
    %c0_0 = arith.constant 0 : index
    %c0_1 = arith.constant 0 : index
    %0 = vector.load %arg1[%c0, %c0_0, %c0_1] : memref<2x8x32xf32, #tpu.memory_space<vmem>>, vector<2x8x32xf32>
    %c0_2 = arith.constant 0 : index
    %c0_3 = arith.constant 0 : index
    %c0_4 = arith.constant 0 : index
    %1 = vector.load %arg2[%c0_2, %c0_3, %c0_4] : memref<1x1x32xf32, #tpu.memory_space<vmem>>, vector<1x1x32xf32>
    %2 = vector.broadcast %1 : vector<1x1x32xf32> to vector<2x8x32xf32>
    %3 = arith.mulf %0, %2 : vector<2x8x32xf32>
    %cst = arith.constant dense<0.000000e+00> : vector<2x8xf32>
    %4 = vector.multi_reduction <add>, %3, %cst [2] : vector<2x8x32xf32> to vector<2x8xf32>
    %cst_5 = arith.constant dense<0xFF800000> : vector<2xf32>
    %5 = vector.multi_reduction <maximumf>, %4, %cst_5 [1] : vector<2x8xf32> to vector<2xf32>
    %6 = vector.shape_cast %5 : vector<2xf32> to vector<2x1xf32>
    %7 = vector.broadcast %6 : vector<2x1xf32> to vector<2x8xf32>
    %8 = arith.subf %4, %7 : vector<2x8xf32>
    %9 = math.exp %8 : vector<2x8xf32>
    %cst_6 = arith.constant dense<0.000000e+00> : vector<2xf32>
    %10 = vector.multi_reduction <add>, %9, %cst_6 [1] : vector<2x8xf32> to vector<2xf32>
    %11 = vector.shape_cast %10 : vector<2xf32> to vector<2x1xf32>
    %12 = vector.broadcast %11 : vector<2x1xf32> to vector<2x8xf32>
    %13 = arith.divf %9, %12 : vector<2x8xf32>
    %c0_7 = arith.constant 0 : index
    %c0_8 = arith.constant 0 : index
    %14 = vector.load %arg3[%c0_7, %c0_8] : memref<2x8xf32, #tpu.memory_space<vmem>>, vector<2x8xf32>
    tpu.vector_store %arg3[%c0_7, %c0_8], %13 {strides = array<i32>} : memref<2x8xf32, #tpu.memory_space<vmem>>, vector<2x8xf32>,
    return
  }
  func.func @transform_0(%arg0: i32) -> (i32, i32, i32) {
    %c0_i32 = arith.constant 0 : i32
    %c0_i32_0 = arith.constant 0 : i32
    %c0_i32_1 = arith.constant 0 : i32
    return %arg0, %c0_i32, %c0_i32_0 : i32, i32, i32
  }
  func.func @transform_1(%arg0: i32) -> (i32, i32, i32) {
    %c0_i32 = arith.constant 0 : i32
    %c0_i32_0 = arith.constant 0 : i32
    %c0_i32_1 = arith.constant 0 : i32
    %c0_i32_2 = arith.constant 0 : i32
    return %c0_i32, %c0_i32_0, %c0_i32_1 : i32, i32, i32
  }
  func.func @transform_2(%arg0: i32) -> (i32, i32) {
    %c0_i32 = arith.constant 0 : i32
    %c0_i32_0 = arith.constant 0 : i32
    return %arg0, %c0_i32 : i32, i32
  }
}

</mosaic_0001>

<bundles_post_ra>
// kernel: tpu_custom_call.1
= control target key start
LH: loop header
LB: loop body
LE: loop exit
PB: predicated region body
PF: predicated region fallthrough
CT: control target
= control target key end

     0   :  { %7 = vsyncpa [#allocation3], 0  ;;  %s245_s0 = inlined_call_operand.hbm [shape: f32[2,8,32], index: 0, kind: input, shape index: {}]   ;;  %s246_s1 = inlined_call_operand.vmem [shape: f32[1,1,32], index: 1, kind: input, shape index: {}]   ;;  %s247_s2 = inlined_call_operand.hbm [shape: f32[2,8], index: 2, kind: output, shape index: {}]  }
   0x1   :  { %8 = vsyncpa [#allocation4], 0  ;;  %s210_s9 = smov [#allocation2]  }
   0x2   :  { %s14_s10 = sshll.u32 %s210_s9, 4  ;;  %s15_s10 = int_to_ptr.vmem [resolvable:$true] %s14_s10 }
   0x3   :  { %s174_s11 = scalar_lea.vmem %s15_s10, 256  ;;  %p179_p1 = scmp.lt.s32.totalorder %s15_s10, %s15_s10 }
   0x4   :  { %p175_p0 = scmp.ne.s32.totalorder %s15_s10, %s174_s11  ;;  %p180_p2 = scmp.lt.s32.totalorder %s174_s11, %s174_s11 }
   0x6   :  { %p181_p3 = por %p180_p2, %p179_p1 }
   0x8   :  { %p182_p4 = pnand %p181_p3, %p175_p0 }
   0xa   :  { %185 = shalt.err (!%p182_p4)
}
   0xb   :  { %s211_s12 = smov 128   ;;  %s212_s13 = smov 8  }
   0xc   :  { %20 = dma.hbm_to_vmem [thread:$0]  %s245_s0, 256, %s15_s10, [#allocation3], %s211_s12, %s211_s12, %s212_s13  }
   0xd   :  { %206 = dma.done.wait [#allocation3], 256  }
   0xe   :  { %207 = vsyncadd [#allocation3], 4294967040  ;;  %v26_v0 = vld [vmem:[#allocation2] sm:$0xff]  ;;  %vm37_vm0 = vcmask 261120   ;;  %v27_v2 = vld [vmem:[#allocation2 + $0x8] sm:$0xff]  ;;  %v46_v7 = vlaneseq  ;;  %vm56_vm1 = vcmask 1041409  }
   0xf   :  { %v150_v1 = vld [vmem:[%s246_s1] ss:$0 sm:$0xff]  ;;  %vm59_vm2 = vcmask 58368   ;;  %v213_v17 = vmov 0   ;;  %s214_s0 = smov [#allocation5]  }
  0x10   :  { %v35_v3 = vmul.f32 %v150_v1, %v26_v0  ;;  %v36_v4 = vmul.f32 %v150_v1, %v27_v2  ;;  %v47_v8 = vand.u32 127, %v46_v7  ;;  %v49_v9 = vshrl.u32 %v46_v7, 7  ;;  %157 = vset.pattern.permute.xlu0 %v213_v17  ;;  %156 = vset.pattern.permute.xlu1 %v213_v17  ;;  %s141_s1 = sshll.u32 %s214_s0, 4  ;;  %s142_s1 = int_to_ptr.vmem [resolvable:$true] %s141_s1 }
  0x11   :  { %s186_s18 = scalar_lea.vmem %s142_s1, 32  ;;  %p191_p6 = scmp.lt.s32.totalorder %s142_s1, %s142_s1 }
  0x12   :  { %v38_v5 = vsel %vm37_vm0, %v35_v3, 0.0  ;;  %v41_v6 = vsel %vm37_vm0, %v36_v4, 0.0  ;;  %v50_v11 = vsub.s32 %v47_v8, %v49_v9  ;;  %v66_v18 = vsub.s32 0, %v49_v9  ;;  %p187_p5 = scmp.ne.s32.totalorder %s142_s1, %s186_s18  ;;  %p192_p7 = scmp.lt.s32.totalorder %s186_s18, %s186_s18 }
  0x13   :  { %39 = vadd.xlane.f32.xlu0 %v38_v5  ;;  %v70_v19 = vsub.s32 1, %v49_v9 }
  0x14   :  { %p193_p8 = por %p192_p7, %p191_p6 }
  0x16   :  { %p194_p9 = pnand %p193_p8, %p187_p5 }
  0x17   :  { %42 = vadd.xlane.f32.xlu0 %v41_v6 }
  0x9c   :  { %v40_v10 = vpop.xlane.xlu0 %39 }
  0x9d   :  { %v51_v13 = vrot.slane %v40_v10, %v50_v11 }
  0xa0   :  { %v43_v12 = vpop.xlane.xlu0 %42 }
  0xa1   :  { %v55_v14 = vrot.slane %v43_v12, %v50_v11 }
  0xa3   :  { %v57_v15 = vsel %vm56_vm1, %v55_v14, %v51_v13 }
  0xa4   :  { %v60_v16 = vsel %vm59_vm2, %v57_v15, -inf }
  0xa5   :  { %61 = vmax.xlane.f32.xlu1 %v60_v16 }
 0x12e   :  { %v62_v20 = vpop.xlane.xlu1 %61 }
 0x12f   :  { %v67_v21 = vrot.slane %v62_v20, %v66_v18  ;;  %v71_v22 = vrot.slane %v62_v20, %v70_v19 }
 0x131   :  { %v74_v23 = vsub.f32 %v40_v10, %v67_v21  ;;  %v75_v24 = vsub.f32 %v43_v12, %v71_v22 }
 0x133   :  { %v76_v25 = vmul.f32 1.442695, %v74_v23  ;;  %v78_v26 = vmul.f32 1.442695, %v75_v24 }
 0x135   :  { %158 = vpow2.f32 %v76_v25 }
 0x136   :  { %160 = vpow2.f32 %v78_v26 }
 0x142   :  { %v159_v27 = vpop.eup %158 }
 0x143   :  { %v161_v28 = vpop.eup %160  ;;  %83 = vperm.xlu1 %156, %v159_v27  }
 0x144   :  { %86 = vperm.xlu0 %157, %v161_v28  }
 0x1be   :  { %v84_v29 = vpop.permute.xlu1 %83 }
 0x1bf   :  { %v87_v30 = vpop.permute.xlu0 %86  ;;  %v91_v31 = vrot.slane %v84_v29, %v50_v11 }
 0x1c0   :  { %v95_v32 = vrot.slane %v87_v30, %v50_v11 }
 0x1c2   :  { %v96_v33 = vsel %vm56_vm1, %v95_v32, %v91_v31 }
 0x1c3   :  { %v98_v34 = vsel %vm59_vm2, %v96_v33, 0.0 }
 0x1c4   :  { %99 = vadd.xlane.f32.xlu1 %v98_v34 }
 0x24d   :  { %v100_v35 = vpop.xlane.xlu1 %99 }
 0x24e   :  { %v105_v36 = vrot.slane %v100_v35, %v66_v18  ;;  %v109_v37 = vrot.slane %v100_v35, %v70_v19 }
 0x250   :  { %162 = vrcp.f32 %v105_v36 }
 0x251   :  { %164 = vrcp.f32 %v109_v37 }
 0x25d   :  { %v163_v38 = vpop.eup %162 }
 0x25e   :  { %v113_v39 = vmul.f32 %v163_v38, %v159_v27  ;;  %v165_v40 = vpop.eup %164 }
 0x25f   :  { %v115_v41 = vmul.f32 %v165_v40, %v161_v28 }
 0x260   :  { %119 = vperm.xlu0 %157, %v113_v39  }
 0x264   :  { %122 = vperm.xlu0 %157, %v115_v41  }
 0x2db   :  { %v120_v42 = vpop.permute.xlu0 %119 }
 0x2dc   :  { %v127_v44 = vrot.slane %v120_v42, %v50_v11 }
 0x2df   :  { %v123_v43 = vpop.permute.xlu0 %122 }
 0x2e0   :  { %v131_v45 = vrot.slane %v123_v43, %v50_v11 }
 0x2e2   :  { %v132_v46 = vsel %vm56_vm1, %v131_v45, %v127_v44 }
 0x2e3   :  { %134 = vst.msk [vmem:[#allocation5] sm:$0x3] %vm59_vm2, %v132_v46 }
 0x2e4   :  { %197 = shalt.err (!%p194_p9)
}
 0x2e5   :  { %144 = dma.vmem_to_hbm [thread:$0]  %s142_s1, 32, %s247_s2, [#allocation4]  }
 0x2e6   :  { %208 = dma.done.wait [#allocation4], 32  }
 0x2e7   :  { %209 = vsyncadd [#allocation4], 4294967264 }
 0x2e8   :  { %148 = vsyncpa [#allocation3], 1 }
 0x2e9   :  { %149 = vsyncpa [#allocation4], 1 }

</bundles_post_ra>
